<compile_context>
chip_gen: v6e
topology: v6e:2x2x1
jax: 0.10.0
libtpu: 0.0.40
codegen_flags: <defaults>
</compile_context>

<pallas_src>
import jax
import jax.numpy as jnp
from jax.experimental import pallas as pl
from jax.experimental.pallas import tpu as pltpu

_LANES = 128
_SUBLANES = 8
# Applied to the already-f32-upcast logits of masked elements (never stored in
# the input dtype, so no f16 overflow hazard).  With x = -1e30 and t = 0 every
# partial sum contribution is exactly 0: sigmoid -> 0, max(x,0) -> 0,
# x*t -> 0, log1p(exp(-|x|)) -> 0.
_NEG_BIG = -1e30


def _round_up(v, m):
    return ((v + m - 1) // m) * m


def _make_kernel(*, bt, ts, chunk, k_inner, d_valid, n_chunks, unroll):
    """Builds the fused BCE+Dice partial-sum kernel for one block layout."""

    def kernel(x_ref, t_ref, o_ref, acc_ref):
        # x_ref / t_ref: (bt, ts, 128) tile(s) of flattened logits / targets
        # o_ref:         (bt, 1, 4, 128) per-sample lane-wise partial sums
        #                rows = [intersection, sigmoid_sum, target_sum, bce_sum]
        # acc_ref:       (bt, 4, chunk, 128) VMEM accumulator across the k axis
        k = pl.program_id(2)

        @pl.when(k == 0)
        def _():
            acc_ref[...] = jnp.zeros_like(acc_ref)

        # Global row offset of this tile along the (padded) row axis.
        row0 = (pl.program_id(1) * k_inner + k) * ts
        # Flat element index within a (chunk, 128) slab, reused every iteration.
        base = (jax.lax.broadcasted_iota(jnp.int32, (chunk, _LANES), 0) * _LANES
                + jax.lax.broadcasted_iota(jnp.int32, (chunk, _LANES), 1))

        for s in range(bt):  # static: samples packed in this block

            def body(i, carry):
                inter, sig, tgt, bces = carry
                r0 = pl.multiple_of(i * chunk, chunk)
                x = x_ref[s, pl.ds(r0, chunk), :].astype(jnp.float32)
                t = t_ref[s, pl.ds(r0, chunk), :].astype(jnp.float32)

                # Mask ragged tail / padding: one scalar limit, one compare.
                limit = d_valid - (row0 + i * chunk) * _LANES
                m = base < limit
                x = jnp.where(m, x, _NEG_BIG)
                t = jnp.where(m, t, 0.0)

                # One exp per element, reused for sigmoid and the BCE log term.
                e = jnp.exp(-jnp.abs(x))                       # EUP
                r = pl.reciprocal(1.0 + e, approx=False)       # exact, 1e-5 parity
                sg = jnp.where(x >= 0.0, r, e * r)             # sigmoid(x)
                # Stable BCE-with-logits (== F.binary_cross_entropy_with_logits).
                b = jnp.maximum(x, 0.0) - x * t + jnp.log1p(e)

                return (inter + sg * t, sig + sg, tgt + t, bces + b)

            z = jnp.zeros((chunk, _LANES), jnp.float32)
            inter, sig, tgt, bces = jax.lax.fori_loop(
                0, n_chunks, body, (z, z, z, z), unroll=unroll)

            acc_ref[s, 0] += inter
            acc_ref[s, 1] += sig
            acc_ref[s, 2] += tgt
            acc_ref[s, 3] += bces

        @pl.when(k == pl.num_programs(2) - 1)
        def _():
            for s in range(bt):
                # Sublane reduce per sample; final 128-lane reduce happens in JAX.
                o_ref[s, 0] = jnp.sum(acc_ref[s], axis=1)      # (4, 128)

    return kernel


def bce_dice_loss(logits, target, *, tile_rows=1024, k_split=None):
    assert logits.shape == target.shape
    n = logits.shape[0]
    d = 1
    for s in logits.shape[1:]:
        d *= s

    # Keep the native dtype through the DMA (upcast to f32 inside the kernel).
    x = logits.reshape(n, d)
    t = target.reshape(n, d)

    def sub_mult(dt):
        # packed-dtype sublane multiple: f32 -> 8, bf16/f16 -> 16, int8 -> 32
        return max(_SUBLANES, 32 // jnp.dtype(dt).itemsize)

    chunk = max(sub_mult(x.dtype), sub_mult(t.dtype))

    # Pad only to the next chunk*128 elements (often already satisfied).  The
    # padded tail is masked in-kernel, so the pad value is irrelevant.
    d_pad = _round_up(d, chunk * _LANES)
    if d_pad != d:
        x = jnp.pad(x, ((0, 0), (0, d_pad - d)))
        t = jnp.pad(t, ((0, 0), (0, d_pad - d)))
    n_rows = d_pad // _LANES

    tile_rows = _round_up(max(tile_rows, chunk), chunk)
    if n_rows <= tile_rows:
        # Small-D path: pack several samples per block so per-step overhead
        # does not dominate.
        ts = n_rows
        bt = max(1, min(n, tile_rows // n_rows, 64))
        num_k = 1
    else:
        ts = tile_rows
        bt = 1
        num_k = pl.cdiv(n_rows, ts)
    num_b = pl.cdiv(n, bt)

    if k_split is None:
        # v7x has 2 TensorCores; split the reduction axis when the batch axis
        # cannot feed both.  No effect on single-TC v5e/v6e.
        k_split = 2 if (num_b == 1 and num_k >= 2 and num_k % 2 == 0) else 1
    k_inner = pl.cdiv(num_k, k_split)

    x3 = x.reshape(n, n_rows, _LANES)
    t3 = t.reshape(n, n_rows, _LANES)

    n_chunks = ts // chunk
    kernel = _make_kernel(bt=bt, ts=ts, chunk=chunk, k_inner=k_inner,
                          d_valid=d, n_chunks=n_chunks,
                          unroll=min(8, n_chunks))

    cost = pl.CostEstimate(
        flops=14 * n * d,
        transcendentals=3 * n * d,
        bytes_accessed=(x3.dtype.itemsize + t3.dtype.itemsize) * n * d_pad
        + n * k_split * 4 * _LANES * 4,
    )

    partials = pl.pallas_call(
        kernel,
        out_shape=jax.ShapeDtypeStruct((n, k_split, 4, _LANES), jnp.float32),
        grid_spec=pltpu.PrefetchScalarGridSpec(
            num_scalar_prefetch=0,
            grid=(num_b, k_split, k_inner),      # samples, k-chunks, reduction
            in_specs=[
                pl.BlockSpec((bt, ts, _LANES),
                             lambda b, c, k: (b, c * k_inner + k, 0)),
                pl.BlockSpec((bt, ts, _LANES),
                             lambda b, c, k: (b, c * k_inner + k, 0)),
            ],
            out_specs=pl.BlockSpec((bt, 1, 4, _LANES),
                                   lambda b, c, k: (b, c, 0, 0)),
            scratch_shapes=[pltpu.VMEM((bt, 4, chunk, _LANES), jnp.float32)],
        ),
        compiler_params=pltpu.CompilerParams(
            dimension_semantics=("parallel", "parallel", "arbitrary"),
            vmem_limit_bytes=32 * 1024 * 1024,   # safe on v5e/v6e/v7x
        ),
        cost_estimate=cost,
    )(x3, t3)

    sums = jnp.sum(partials, axis=(1, 3))        # (N, 4) tiny epilogue in JAX
    inter_s = sums[:, 0]
    sig_s = sums[:, 1]
    tgt_s = sums[:, 2]
    bce_s = sums[:, 3]

    smooth = 1e-05
    bce = jnp.sum(bce_s) / (n * d)               # 'mean' over all elements
    dice = (2.0 * inter_s + smooth) / (sig_s + tgt_s + smooth)
    dice = 1.0 - jnp.sum(dice) / n
    return 0.5 * bce + 0.5 * dice


def _reference(logits, target):
    x = logits.astype(jnp.float32)
    t = target.astype(jnp.float32)
    bce = jnp.mean(jnp.maximum(x, 0.0) - x * t + jnp.log1p(jnp.exp(-jnp.abs(x))))
    n = x.shape[0]
    s = jax.nn.sigmoid(x).reshape(n, -1)
    tt = t.reshape(n, -1)
    smooth = 1e-05
    dice = (2.0 * jnp.sum(s * tt, axis=1) + smooth) / (
        jnp.sum(s, axis=1) + jnp.sum(tt, axis=1) + smooth
    )
    dice = 1.0 - jnp.sum(dice) / n
    return 0.5 * bce + 0.5 * dice


if __name__ == "__main__":
    key = jax.random.PRNGKey(0)
    k1, k2, k3, k4 = jax.random.split(key, 4)

    # Case 1: NCHW shapes matching the PyTorch module (small-D batched path).
    logits = jax.random.normal(k1, (2, 4, 16, 16), dtype=jnp.float32)
    target = (jax.random.uniform(k2, (2, 4, 16, 16)) > 0.5).astype(jnp.float32)
    out = jax.block_until_ready(bce_dice_loss(logits, target))
    ref = _reference(logits, target)
    assert jnp.allclose(out, ref, rtol=1e-5, atol=1e-5), (out, ref)

    # Case 2: single sample, ragged D (not a multiple of 1024), multi-tile
    # reduction with a 2-way k-split (dual-TensorCore path on v7x).
    logits2 = jax.random.normal(k3, (1, 3, 63, 64), dtype=jnp.float32)
    target2 = (jax.random.uniform(k4, (1, 3, 63, 64)) > 0.5).astype(jnp.float32)
    out2 = jax.block_until_ready(bce_dice_loss(logits2, target2, tile_rows=48))
    ref2 = _reference(logits2, target2)
    assert jnp.allclose(out2, ref2, rtol=1e-5, atol=1e-5), (out2, ref2)

    # Case 3: bf16 logits kept narrow through the DMA (packed 16-row tiles,
    # in-kernel masking of the dtype-padding tail).
    logits3 = logits.astype(jnp.bfloat16)
    out3 = jax.block_until_ready(bce_dice_loss(logits3, target))
    ref3 = _reference(logits3, target)
    assert jnp.allclose(out3, ref3, rtol=1e-5, atol=1e-5), (out3, ref3)

    print("KERNEL_OK")
</pallas_src>

<mosaic_0001>
module attributes {stable_mosaic.version = 11 : i64} {
  func.func @kernel(%arg0: i32, %arg1: i32, %arg2: i32, %arg3: memref<2x8x128xf32, #tpu.memory_space<vmem>>, %arg4: memref<2x8x128xf32, #tpu.memory_space<vmem>>, %arg5: memref<2x1x4x128xf32, #tpu.memory_space<vmem>>, %arg6: memref<2x4x8x128xf32, #tpu.memory_space<vmem>>) attributes {dimension_semantics = [#tpu.dimension_semantics<parallel>, #tpu.dimension_semantics<parallel>, #tpu.dimension_semantics<arbitrary>], iteration_bounds = array<i64: 1, 1, 1>, scalar_prefetch = 0 : i64, scratch_operands = 1 : i64, tpu.core_type = #tpu.core_type<tc>, window_params = [{transform_indices = @transform_0, window_bounds = array<i64: 2, 8, 128>}, {transform_indices = @transform_1, window_bounds = array<i64: 2, 8, 128>}, {transform_indices = @transform_2, window_bounds = array<i64: 2, 1, 4, 128>}]} {
    %c0_i32 = arith.constant 0 : i32
    %0 = arith.cmpi eq, %arg2, %c0_i32 : i32
    %1 = arith.extui %0 : i1 to i32
    %c0_i32_0 = arith.constant 0 : i32
    %2 = arith.cmpi ne, %1, %c0_i32_0 : i32
    scf.if %2 {
      %cst_95 = arith.constant 0.000000e+00 : f32
      %144 = vector.broadcast %cst_95 : f32 to vector<2x4x8x128xf32>
      %c0_96 = arith.constant 0 : index
      %c0_97 = arith.constant 0 : index
      %c0_98 = arith.constant 0 : index
      %c0_99 = arith.constant 0 : index
      %145 = vector.load %arg6[%c0_96, %c0_97, %c0_98, %c0_99] : memref<2x4x8x128xf32, #tpu.memory_space<vmem>>, vector<2x4x8x128xf32>
      tpu.vector_store %arg6[%c0_96, %c0_97, %c0_98, %c0_99], %144 {strides = array<i32>} : memref<2x4x8x128xf32, #tpu.memory_space<vmem>>, vector<2x4x8x128xf32>,
    } else {
    }
    %c1_i32 = arith.constant 1 : i32
    %3 = arith.muli %arg1, %c1_i32 : i32
    %4 = arith.addi %3, %arg2 : i32
    %c8_i32 = arith.constant 8 : i32
    %5 = arith.muli %4, %c8_i32 : i32
    %6 = tpu.iota {dimensions = array<i32: 0>} : vector<8x128xi32>
    %c128_i32 = arith.constant 128 : i32
    %7 = vector.broadcast %c128_i32 : i32 to vector<8x128xi32>
    %8 = arith.muli %6, %7 : vector<8x128xi32>
    %9 = tpu.iota {dimensions = array<i32: 1>} : vector<8x128xi32>
    %10 = arith.addi %8, %9 : vector<8x128xi32>
    %cst = arith.constant 0.000000e+00 : f32
    %11 = vector.broadcast %cst : f32 to vector<8x128xf32>
    %c0_i32_1 = arith.constant 0 : i32
    %c8_i32_2 = arith.constant 8 : i32
    %12 = arith.muli %c0_i32_1, %c8_i32_2 : i32
    %13 = tpu.assume_multiple %12, 8 : i32
    %c0 = arith.constant 0 : index
    %14 = arith.index_cast %13 : i32 to index
    %c0_3 = arith.constant 0 : index
    %15 = vector.load %arg3[%c0, %14, %c0_3] : memref<2x8x128xf32, #tpu.memory_space<vmem>>, vector<1x8x128xf32>
    %16 = vector.shape_cast %15 : vector<1x8x128xf32> to vector<8x128xf32>
    %c0_4 = arith.constant 0 : index
    %17 = arith.index_cast %13 : i32 to index
    %c0_5 = arith.constant 0 : index
    %18 = vector.load %arg4[%c0_4, %17, %c0_5] : memref<2x8x128xf32, #tpu.memory_space<vmem>>, vector<1x8x128xf32>
    %19 = vector.shape_cast %18 : vector<1x8x128xf32> to vector<8x128xf32>
    %c8_i32_6 = arith.constant 8 : i32
    %20 = arith.muli %c0_i32_1, %c8_i32_6 : i32
    %21 = arith.addi %5, %20 : i32
    %c128_i32_7 = arith.constant 128 : i32
    %22 = arith.muli %21, %c128_i32_7 : i32
    %c1024_i32 = arith.constant 1024 : i32
    %23 = arith.subi %c1024_i32, %22 : i32
    %24 = vector.broadcast %23 : i32 to vector<8x128xi32>
    %25 = arith.cmpi slt, %10, %24 : vector<8x128xi32>
    %cst_8 = arith.constant -1.000000e+30 : f32
    %26 = vector.broadcast %cst_8 : f32 to vector<8x128xf32>
    %27 = arith.select %25, %16, %26 : vector<8x128xi1>, vector<8x128xf32>
    %cst_9 = arith.constant 0.000000e+00 : f32
    %28 = vector.broadcast %cst_9 : f32 to vector<8x128xf32>
    %29 = arith.select %25, %19, %28 : vector<8x128xi1>, vector<8x128xf32>
    %30 = math.absf %27 : vector<8x128xf32>
    %cst_10 = arith.constant 0.000000e+00 : f32
    %31 = vector.broadcast %cst_10 : f32 to vector<8x128xf32>
    %32 = arith.subf %31, %30 : vector<8x128xf32>
    %33 = math.exp %32 : vector<8x128xf32>
    %cst_11 = arith.constant 1.000000e+00 : f32
    %34 = vector.broadcast %cst_11 : f32 to vector<8x128xf32>
    %35 = arith.addf %34, %33 : vector<8x128xf32>
    %36 = tpu.reciprocal %35 : vector<8x128xf32> -> vector<8x128xf32>
    %cst_12 = arith.constant 0.000000e+00 : f32
    %37 = vector.broadcast %cst_12 : f32 to vector<8x128xf32>
    %38 = arith.cmpf oge, %27, %37 : vector<8x128xf32>
    %39 = arith.mulf %33, %36 : vector<8x128xf32>
    %40 = arith.select %38, %36, %39 : vector<8x128xi1>, vector<8x128xf32>
    %cst_13 = arith.constant 0.000000e+00 : f32
    %41 = vector.broadcast %cst_13 : f32 to vector<8x128xf32>
    %42 = arith.maximumf %27, %41 : vector<8x128xf32>
    %43 = arith.mulf %27, %29 : vector<8x128xf32>
    %44 = arith.subf %42, %43 : vector<8x128xf32>
    %45 = math.log1p %33 : vector<8x128xf32>
    %46 = arith.addf %44, %45 : vector<8x128xf32>
    %47 = arith.mulf %40, %29 : vector<8x128xf32>
    %48 = arith.addf %11, %47 : vector<8x128xf32>
    %49 = arith.addf %11, %40 : vector<8x128xf32>
    %50 = arith.addf %11, %29 : vector<8x128xf32>
    %51 = arith.addf %11, %46 : vector<8x128xf32>
    %c1_i32_14 = arith.constant 1 : i32
    %c0_15 = arith.constant 0 : index
    %c0_16 = arith.constant 0 : index
    %c0_17 = arith.constant 0 : index
    %c0_18 = arith.constant 0 : index
    %52 = vector.load %arg6[%c0_15, %c0_16, %c0_17, %c0_18] : memref<2x4x8x128xf32, #tpu.memory_space<vmem>>, vector<1x1x8x128xf32>
    %53 = vector.shape_cast %52 : vector<1x1x8x128xf32> to vector<8x128xf32>
    %54 = arith.addf %53, %48 : vector<8x128xf32>
    %c0_19 = arith.constant 0 : index
    %c0_20 = arith.constant 0 : index
    %c0_21 = arith.constant 0 : index
    %c0_22 = arith.constant 0 : index
    %55 = vector.load %arg6[%c0_19, %c0_20, %c0_21, %c0_22] : memref<2x4x8x128xf32, #tpu.memory_space<vmem>>, vector<1x1x8x128xf32>
    %56 = vector.shape_cast %55 : vector<1x1x8x128xf32> to vector<8x128xf32>
    %57 = vector.shape_cast %54 : vector<8x128xf32> to vector<1x1x8x128xf32>
    tpu.vector_store %arg6[%c0_19, %c0_20, %c0_21, %c0_22], %57 {strides = array<i32>} : memref<2x4x8x128xf32, #tpu.memory_space<vmem>>, vector<1x1x8x128xf32>,
    %c0_23 = arith.constant 0 : index
    %c1 = arith.constant 1 : index
    %c0_24 = arith.constant 0 : index
    %c0_25 = arith.constant 0 : index
    %58 = vector.load %arg6[%c0_23, %c1, %c0_24, %c0_25] : memref<2x4x8x128xf32, #tpu.memory_space<vmem>>, vector<1x1x8x128xf32>
    %59 = vector.shape_cast %58 : vector<1x1x8x128xf32> to vector<8x128xf32>
    %60 = arith.addf %59, %49 : vector<8x128xf32>
    %c0_26 = arith.constant 0 : index
    %c1_27 = arith.constant 1 : index
    %c0_28 = arith.constant 0 : index
    %c0_29 = arith.constant 0 : index
    %61 = vector.load %arg6[%c0_26, %c1_27, %c0_28, %c0_29] : memref<2x4x8x128xf32, #tpu.memory_space<vmem>>, vector<1x1x8x128xf32>
    %62 = vector.shape_cast %61 : vector<1x1x8x128xf32> to vector<8x128xf32>
    %63 = vector.shape_cast %60 : vector<8x128xf32> to vector<1x1x8x128xf32>
    tpu.vector_store %arg6[%c0_26, %c1_27, %c0_28, %c0_29], %63 {strides = array<i32>} : memref<2x4x8x128xf32, #tpu.memory_space<vmem>>, vector<1x1x8x128xf32>,
    %c0_30 = arith.constant 0 : index
    %c2 = arith.constant 2 : index
    %c0_31 = arith.constant 0 : index
    %c0_32 = arith.constant 0 : index
    %64 = vector.load %arg6[%c0_30, %c2, %c0_31, %c0_32] : memref<2x4x8x128xf32, #tpu.memory_space<vmem>>, vector<1x1x8x128xf32>
    %65 = vector.shape_cast %64 : vector<1x1x8x128xf32> to vector<8x128xf32>
    %66 = arith.addf %65, %50 : vector<8x128xf32>
    %c0_33 = arith.constant 0 : index
    %c2_34 = arith.constant 2 : index
    %c0_35 = arith.constant 0 : index
    %c0_36 = arith.constant 0 : index
    %67 = vector.load %arg6[%c0_33, %c2_34, %c0_35, %c0_36] : memref<2x4x8x128xf32, #tpu.memory_space<vmem>>, vector<1x1x8x128xf32>
    %68 = vector.shape_cast %67 : vector<1x1x8x128xf32> to vector<8x128xf32>
    %69 = vector.shape_cast %66 : vector<8x128xf32> to vector<1x1x8x128xf32>
    tpu.vector_store %arg6[%c0_33, %c2_34, %c0_35, %c0_36], %69 {strides = array<i32>} : memref<2x4x8x128xf32, #tpu.memory_space<vmem>>, vector<1x1x8x128xf32>,
    %c0_37 = arith.constant 0 : index
    %c3 = arith.constant 3 : index
    %c0_38 = arith.constant 0 : index
    %c0_39 = arith.constant 0 : index
    %70 = vector.load %arg6[%c0_37, %c3, %c0_38, %c0_39] : memref<2x4x8x128xf32, #tpu.memory_space<vmem>>, vector<1x1x8x128xf32>
    %71 = vector.shape_cast %70 : vector<1x1x8x128xf32> to vector<8x128xf32>
    %72 = arith.addf %71, %51 : vector<8x128xf32>
    %c0_40 = arith.constant 0 : index
    %c3_41 = arith.constant 3 : index
    %c0_42 = arith.constant 0 : index
    %c0_43 = arith.constant 0 : index
    %73 = vector.load %arg6[%c0_40, %c3_41, %c0_42, %c0_43] : memref<2x4x8x128xf32, #tpu.memory_space<vmem>>, vector<1x1x8x128xf32>
    %74 = vector.shape_cast %73 : vector<1x1x8x128xf32> to vector<8x128xf32>
    %75 = vector.shape_cast %72 : vector<8x128xf32> to vector<1x1x8x128xf32>
    tpu.vector_store %arg6[%c0_40, %c3_41, %c0_42, %c0_43], %75 {strides = array<i32>} : memref<2x4x8x128xf32, #tpu.memory_space<vmem>>, vector<1x1x8x128xf32>,
    %cst_44 = arith.constant 0.000000e+00 : f32
    %76 = vector.broadcast %cst_44 : f32 to vector<8x128xf32>
    %c0_i32_45 = arith.constant 0 : i32
    %c8_i32_46 = arith.constant 8 : i32
    %77 = arith.muli %c0_i32_45, %c8_i32_46 : i32
    %78 = tpu.assume_multiple %77, 8 : i32
    %c1_47 = arith.constant 1 : index
    %79 = arith.index_cast %78 : i32 to index
    %c0_48 = arith.constant 0 : index
    %80 = vector.load %arg3[%c1_47, %79, %c0_48] : memref<2x8x128xf32, #tpu.memory_space<vmem>>, vector<1x8x128xf32>
    %81 = vector.shape_cast %80 : vector<1x8x128xf32> to vector<8x128xf32>
    %c1_49 = arith.constant 1 : index
    %82 = arith.index_cast %78 : i32 to index
    %c0_50 = arith.constant 0 : index
    %83 = vector.load %arg4[%c1_49, %82, %c0_50] : memref<2x8x128xf32, #tpu.memory_space<vmem>>, vector<1x8x128xf32>
    %84 = vector.shape_cast %83 : vector<1x8x128xf32> to vector<8x128xf32>
    %c8_i32_51 = arith.constant 8 : i32
    %85 = arith.muli %c0_i32_45, %c8_i32_51 : i32
    %86 = arith.addi %5, %85 : i32
    %c128_i32_52 = arith.constant 128 : i32
    %87 = arith.muli %86, %c128_i32_52 : i32
    %c1024_i32_53 = arith.constant 1024 : i32
    %88 = arith.subi %c1024_i32_53, %87 : i32
    %89 = vector.broadcast %88 : i32 to vector<8x128xi32>
    %90 = arith.cmpi slt, %10, %89 : vector<8x128xi32>
    %cst_54 = arith.constant -1.000000e+30 : f32
    %91 = vector.broadcast %cst_54 : f32 to vector<8x128xf32>
    %92 = arith.select %90, %81, %91 : vector<8x128xi1>, vector<8x128xf32>
    %cst_55 = arith.constant 0.000000e+00 : f32
    %93 = vector.broadcast %cst_55 : f32 to vector<8x128xf32>
    %94 = arith.select %90, %84, %93 : vector<8x128xi1>, vector<8x128xf32>
    %95 = math.absf %92 : vector<8x128xf32>
    %cst_56 = arith.constant 0.000000e+00 : f32
    %96 = vector.broadcast %cst_56 : f32 to vector<8x128xf32>
    %97 = arith.subf %96, %95 : vector<8x128xf32>
    %98 = math.exp %97 : vector<8x128xf32>
    %cst_57 = arith.constant 1.000000e+00 : f32
    %99 = vector.broadcast %cst_57 : f32 to vector<8x128xf32>
    %100 = arith.addf %99, %98 : vector<8x128xf32>
    %101 = tpu.reciprocal %100 : vector<8x128xf32> -> vector<8x128xf32>
    %cst_58 = arith.constant 0.000000e+00 : f32
    %102 = vector.broadcast %cst_58 : f32 to vector<8x128xf32>
    %103 = arith.cmpf oge, %92, %102 : vector<8x128xf32>
    %104 = arith.mulf %98, %101 : vector<8x128xf32>
    %105 = arith.select %103, %101, %104 : vector<8x128xi1>, vector<8x128xf32>
    %cst_59 = arith.constant 0.000000e+00 : f32
    %106 = vector.broadcast %cst_59 : f32 to vector<8x128xf32>
    %107 = arith.maximumf %92, %106 : vector<8x128xf32>
    %108 = arith.mulf %92, %94 : vector<8x128xf32>
    %109 = arith.subf %107, %108 : vector<8x128xf32>
    %110 = math.log1p %98 : vector<8x128xf32>
    %111 = arith.addf %109, %110 : vector<8x128xf32>
    %112 = arith.mulf %105, %94 : vector<8x128xf32>
    %113 = arith.addf %76, %112 : vector<8x128xf32>
    %114 = arith.addf %76, %105 : vector<8x128xf32>
    %115 = arith.addf %76, %94 : vector<8x128xf32>
    %116 = arith.addf %76, %111 : vector<8x128xf32>
    %c1_i32_60 = arith.constant 1 : i32
    %c1_61 = arith.constant 1 : index
    %c0_62 = arith.constant 0 : index
    %c0_63 = arith.constant 0 : index
    %c0_64 = arith.constant 0 : index
    %117 = vector.load %arg6[%c1_61, %c0_62, %c0_63, %c0_64] : memref<2x4x8x128xf32, #tpu.memory_space<vmem>>, vector<1x1x8x128xf32>
    %118 = vector.shape_cast %117 : vector<1x1x8x128xf32> to vector<8x128xf32>
    %119 = arith.addf %118, %113 : vector<8x128xf32>
    %c1_65 = arith.constant 1 : index
    %c0_66 = arith.constant 0 : index
    %c0_67 = arith.constant 0 : index
    %c0_68 = arith.constant 0 : index
    %120 = vector.load %arg6[%c1_65, %c0_66, %c0_67, %c0_68] : memref<2x4x8x128xf32, #tpu.memory_space<vmem>>, vector<1x1x8x128xf32>
    %121 = vector.shape_cast %120 : vector<1x1x8x128xf32> to vector<8x128xf32>
    %122 = vector.shape_cast %119 : vector<8x128xf32> to vector<1x1x8x128xf32>
    tpu.vector_store %arg6[%c1_65, %c0_66, %c0_67, %c0_68], %122 {strides = array<i32>} : memref<2x4x8x128xf32, #tpu.memory_space<vmem>>, vector<1x1x8x128xf32>,
    %c1_69 = arith.constant 1 : index
    %c1_70 = arith.constant 1 : index
    %c0_71 = arith.constant 0 : index
    %c0_72 = arith.constant 0 : index
    %123 = vector.load %arg6[%c1_69, %c1_70, %c0_71, %c0_72] : memref<2x4x8x128xf32, #tpu.memory_space<vmem>>, vector<1x1x8x128xf32>
    %124 = vector.shape_cast %123 : vector<1x1x8x128xf32> to vector<8x128xf32>
    %125 = arith.addf %124, %114 : vector<8x128xf32>
    %c1_73 = arith.constant 1 : index
    %c1_74 = arith.constant 1 : index
    %c0_75 = arith.constant 0 : index
    %c0_76 = arith.constant 0 : index
    %126 = vector.load %arg6[%c1_73, %c1_74, %c0_75, %c0_76] : memref<2x4x8x128xf32, #tpu.memory_space<vmem>>, vector<1x1x8x128xf32>
    %127 = vector.shape_cast %126 : vector<1x1x8x128xf32> to vector<8x128xf32>
    %128 = vector.shape_cast %125 : vector<8x128xf32> to vector<1x1x8x128xf32>
    tpu.vector_store %arg6[%c1_73, %c1_74, %c0_75, %c0_76], %128 {strides = array<i32>} : memref<2x4x8x128xf32, #tpu.memory_space<vmem>>, vector<1x1x8x128xf32>,
    %c1_77 = arith.constant 1 : index
    %c2_78 = arith.constant 2 : index
    %c0_79 = arith.constant 0 : index
    %c0_80 = arith.constant 0 : index
    %129 = vector.load %arg6[%c1_77, %c2_78, %c0_79, %c0_80] : memref<2x4x8x128xf32, #tpu.memory_space<vmem>>, vector<1x1x8x128xf32>
    %130 = vector.shape_cast %129 : vector<1x1x8x128xf32> to vector<8x128xf32>
    %131 = arith.addf %130, %115 : vector<8x128xf32>
    %c1_81 = arith.constant 1 : index
    %c2_82 = arith.constant 2 : index
    %c0_83 = arith.constant 0 : index
    %c0_84 = arith.constant 0 : index
    %132 = vector.load %arg6[%c1_81, %c2_82, %c0_83, %c0_84] : memref<2x4x8x128xf32, #tpu.memory_space<vmem>>, vector<1x1x8x128xf32>
    %133 = vector.shape_cast %132 : vector<1x1x8x128xf32> to vector<8x128xf32>
    %134 = vector.shape_cast %131 : vector<8x128xf32> to vector<1x1x8x128xf32>
    tpu.vector_store %arg6[%c1_81, %c2_82, %c0_83, %c0_84], %134 {strides = array<i32>} : memref<2x4x8x128xf32, #tpu.memory_space<vmem>>, vector<1x1x8x128xf32>,
    %c1_85 = arith.constant 1 : index
    %c3_86 = arith.constant 3 : index
    %c0_87 = arith.constant 0 : index
    %c0_88 = arith.constant 0 : index
    %135 = vector.load %arg6[%c1_85, %c3_86, %c0_87, %c0_88] : memref<2x4x8x128xf32, #tpu.memory_space<vmem>>, vector<1x1x8x128xf32>
    %136 = vector.shape_cast %135 : vector<1x1x8x128xf32> to vector<8x128xf32>
    %137 = arith.addf %136, %116 : vector<8x128xf32>
    %c1_89 = arith.constant 1 : index
    %c3_90 = arith.constant 3 : index
    %c0_91 = arith.constant 0 : index
    %c0_92 = arith.constant 0 : index
    %138 = vector.load %arg6[%c1_89, %c3_90, %c0_91, %c0_92] : memref<2x4x8x128xf32, #tpu.memory_space<vmem>>, vector<1x1x8x128xf32>
    %139 = vector.shape_cast %138 : vector<1x1x8x128xf32> to vector<8x128xf32>
    %140 = vector.shape_cast %137 : vector<8x128xf32> to vector<1x1x8x128xf32>
    tpu.vector_store %arg6[%c1_89, %c3_90, %c0_91, %c0_92], %140 {strides = array<i32>} : memref<2x4x8x128xf32, #tpu.memory_space<vmem>>, vector<1x1x8x128xf32>,
    %c0_i32_93 = arith.constant 0 : i32
    %141 = arith.cmpi eq, %arg2, %c0_i32_93 : i32
    %142 = arith.extui %141 : i1 to i32
    %c0_i32_94 = arith.constant 0 : i32
    %143 = arith.cmpi ne, %142, %c0_i32_94 : i32
    scf.if %143 {
      %c0_95 = arith.constant 0 : index
      %c0_96 = arith.constant 0 : index
      %c0_97 = arith.constant 0 : index
      %c0_98 = arith.constant 0 : index
      %144 = vector.load %arg6[%c0_95, %c0_96, %c0_97, %c0_98] : memref<2x4x8x128xf32, #tpu.memory_space<vmem>>, vector<1x4x8x128xf32>
      %145 = vector.shape_cast %144 : vector<1x4x8x128xf32> to vector<4x8x128xf32>
      %cst_99 = arith.constant dense<0.000000e+00> : vector<4x128xf32>
      %146 = vector.multi_reduction <add>, %145, %cst_99 [1] : vector<4x8x128xf32> to vector<4x128xf32>
      %c0_100 = arith.constant 0 : index
      %c0_101 = arith.constant 0 : index
      %c0_102 = arith.constant 0 : index
      %c0_103 = arith.constant 0 : index
      %147 = vector.load %arg5[%c0_100, %c0_101, %c0_102, %c0_103] : memref<2x1x4x128xf32, #tpu.memory_space<vmem>>, vector<1x1x4x128xf32>
      %148 = vector.shape_cast %147 : vector<1x1x4x128xf32> to vector<4x128xf32>
      %149 = vector.shape_cast %146 : vector<4x128xf32> to vector<1x1x4x128xf32>
      tpu.vector_store %arg5[%c0_100, %c0_101, %c0_102, %c0_103], %149 {strides = array<i32>} : memref<2x1x4x128xf32, #tpu.memory_space<vmem>>, vector<1x1x4x128xf32>,
      %c1_104 = arith.constant 1 : index
      %c0_105 = arith.constant 0 : index
      %c0_106 = arith.constant 0 : index
      %c0_107 = arith.constant 0 : index
      %150 = vector.load %arg6[%c1_104, %c0_105, %c0_106, %c0_107] : memref<2x4x8x128xf32, #tpu.memory_space<vmem>>, vector<1x4x8x128xf32>
      %151 = vector.shape_cast %150 : vector<1x4x8x128xf32> to vector<4x8x128xf32>
      %cst_108 = arith.constant dense<0.000000e+00> : vector<4x128xf32>
      %152 = vector.multi_reduction <add>, %151, %cst_108 [1] : vector<4x8x128xf32> to vector<4x128xf32>
      %c1_109 = arith.constant 1 : index
      %c0_110 = arith.constant 0 : index
      %c0_111 = arith.constant 0 : index
      %c0_112 = arith.constant 0 : index
      %153 = vector.load %arg5[%c1_109, %c0_110, %c0_111, %c0_112] : memref<2x1x4x128xf32, #tpu.memory_space<vmem>>, vector<1x1x4x128xf32>
      %154 = vector.shape_cast %153 : vector<1x1x4x128xf32> to vector<4x128xf32>
      %155 = vector.shape_cast %152 : vector<4x128xf32> to vector<1x1x4x128xf32>
      tpu.vector_store %arg5[%c1_109, %c0_110, %c0_111, %c0_112], %155 {strides = array<i32>} : memref<2x1x4x128xf32, #tpu.memory_space<vmem>>, vector<1x1x4x128xf32>,
    } else {
    }
    return
  }
  func.func @transform_0(%arg0: i32, %arg1: i32, %arg2: i32) -> (i32, i32, i32) {
    %c1_i32 = arith.constant 1 : i32
    %0 = arith.muli %arg1, %c1_i32 : i32
    %1 = arith.addi %0, %arg2 : i32
    %c0_i32 = arith.constant 0 : i32
    %c0_i32_0 = arith.constant 0 : i32
    return %arg0, %1, %c0_i32 : i32, i32, i32
  }
  func.func @transform_1(%arg0: i32, %arg1: i32, %arg2: i32) -> (i32, i32, i32) {
    %c1_i32 = arith.constant 1 : i32
    %0 = arith.muli %arg1, %c1_i32 : i32
    %1 = arith.addi %0, %arg2 : i32
    %c0_i32 = arith.constant 0 : i32
    %c0_i32_0 = arith.constant 0 : i32
    return %arg0, %1, %c0_i32 : i32, i32, i32
  }
  func.func @transform_2(%arg0: i32, %arg1: i32, %arg2: i32) -> (i32, i32, i32, i32) {
    %c0_i32 = arith.constant 0 : i32
    %c0_i32_0 = arith.constant 0 : i32
    %c0_i32_1 = arith.constant 0 : i32
    return %arg0, %arg1, %c0_i32, %c0_i32_0 : i32, i32, i32, i32
  }
}

</mosaic_0001>

<bundles_post_ra>
// kernel: tpu_custom_call.1
= control target key start
LH: loop header
LB: loop body
LE: loop exit
PB: predicated region body
PF: predicated region fallthrough
CT: control target
= control target key end

     0   :  { %7 = vsyncpa [#allocation4], 0  ;;  %s400_s0 = inlined_call_operand.hbm [shape: f32[2,8,128], index: 0, kind: input, shape index: {}]   ;;  %s401_s1 = inlined_call_operand.hbm [shape: f32[2,8,128], index: 1, kind: input, shape index: {}]   ;;  %s402_s2 = inlined_call_operand.hbm [shape: f32[2,1,4,128], index: 2, kind: output, shape index: {}]  }
   0x1   :  { %8 = vsyncpa [#allocation7], 0 }
   0x2   :  { %9 = vsyncpa [#allocation5], 0  ;;  %s353_s9 = smov [#allocation3]  }
   0x3   :  { %s18_s10 = sshll.u32 %s353_s9, 4  ;;  %s19_s10 = int_to_ptr.vmem [resolvable:$true] %s18_s10 }
   0x4   :  { %s295_s11 = scalar_lea.vmem %s19_s10, 256  ;;  %p300_p1 = scmp.lt.s32.totalorder %s19_s10, %s19_s10 }
   0x5   :  { %p296_p0 = scmp.ne.s32.totalorder %s19_s10, %s295_s11  ;;  %p301_p2 = scmp.lt.s32.totalorder %s295_s11, %s295_s11 }
   0x7   :  { %p302_p3 = por %p301_p2, %p300_p1 }
   0x9   :  { %p303_p4 = pnand %p302_p3, %p296_p0 }
   0xb   :  { %306 = shalt.err (!%p303_p4)
}
   0xc   :  { %s354_s12 = smov 128   ;;  %s355_s13 = smov 8  }
   0xd   :  { %24 = dma.hbm_to_vmem [thread:$0]  %s400_s0, 256, %s19_s10, [#allocation4], %s354_s12, %s354_s12, %s355_s13  }
   0xe   :  { %s356_s16 = smov [#allocation6]  }
   0xf   :  { %s33_s17 = sshll.u32 %s356_s16, 4  ;;  %s34_s17 = int_to_ptr.vmem [resolvable:$true] %s33_s17 }
  0x10   :  { %s315_s18 = scalar_lea.vmem %s34_s17, 256  ;;  %p320_p6 = scmp.lt.s32.totalorder %s34_s17, %s34_s17 }
  0x11   :  { %p316_p5 = scmp.ne.s32.totalorder %s34_s17, %s315_s18  ;;  %p321_p7 = scmp.lt.s32.totalorder %s315_s18, %s315_s18 }
  0x13   :  { %p322_p8 = por %p321_p7, %p320_p6 }
  0x15   :  { %p323_p9 = pnand %p322_p8, %p316_p5 }
  0x17   :  { %326 = shalt.err (!%p323_p9)
}
  0x18   :  { %39 = dma.hbm_to_vmem [thread:$0]  %s401_s1, 256, %s34_s17, [#allocation7], %s354_s12, %s354_s12, %s355_s13  }
  0x19   :  { %347 = dma.done.wait [#allocation4], 256  }
  0x1a   :  { %348 = vsyncadd [#allocation4], 4294967040 }
  0x1b   :  { %349 = dma.done.wait [#allocation7], 256  }
  0x1c   :  { %350 = vsyncadd [#allocation7], 4294967040  ;;  %v61_v0 = vlaneseq  ;;  %v67_v5 = vld [vmem:[#allocation3] sm:$0xff]  ;;  %v119_v6 = vld [vmem:[#allocation3 + $0x8] sm:$0xff]  ;;  %vm202_vm5 = vcmask 1041409   ;;  %vm204_vm6 = vcmask 1042434  }
  0x1d   :  { %v68_v19 = vld [vmem:[#allocation6] sm:$0xff]  ;;  %v121_v21 = vld [vmem:[#allocation6 + $0x8] sm:$0xff]  ;;  %vm206_vm7 = vcmask 1043459   ;;  %s357_s0 = smov [#allocation8]  }
  0x1e   :  { %v62_v1 = vshrl.u32 %v61_v0, 7  ;;  %v65_v2 = vand.u32 127, %v61_v0  ;;  %s253_s1 = sshll.u32 %s357_s0, 4  ;;  %s254_s1 = int_to_ptr.vmem [resolvable:$true] %s253_s1 }
  0x1f   :  { %s327_s21 = scalar_lea.vmem %s254_s1, 128  ;;  %p332_p11 = scmp.lt.s32.totalorder %s254_s1, %s254_s1 }
  0x20   :  { %v63_v3 = vmul.u32 128, %v62_v1  ;;  %p328_p10 = scmp.ne.s32.totalorder %s254_s1, %s327_s21  ;;  %p333_p12 = scmp.lt.s32.totalorder %s327_s21, %s327_s21 }
  0x22   :  { %v66_v4 = vadd.s32 %v65_v2, %v63_v3  ;;  %p334_p13 = por %p333_p12, %p332_p11 }
  0x24   :  { %vm72_vm0 = vcmp.lt.s32.totalorder %v66_v4, 1024  ;;  %p335_p0 = pnand %p334_p13, %p328_p10 }
  0x25   :  { %v73_v7 = vsel %vm72_vm0, %v67_v5, -1e+30  ;;  %v122_v8 = vsel %vm72_vm0, %v119_v6, -1e+30  ;;  %v74_v22 = vsel %vm72_vm0, %v68_v19, 0.0  ;;  %v123_v25 = vsel %vm72_vm0, %v121_v21, 0.0 }
  0x26   :  { %v75_v9 = vand.u32 2147483647, %v73_v7  ;;  %v124_v10 = vand.u32 2147483647, %v122_v8  ;;  %v186_v24 = vrot.slane %v74_v22, 4  ;;  %v84_v27 = vmax.f32 %v73_v7, 0.0 }
  0x27   :  { %v85_v28 = vmul.f32 %v74_v22, %v73_v7  ;;  %v226_v30 = vrot.slane %v123_v25, 4  ;;  %v133_v31 = vmax.f32 %v122_v8, 0.0  ;;  %v134_v32 = vmul.f32 %v123_v25, %v122_v8 }
  0x28   :  { %v76_v11 = vsub.f32 0.0, %v75_v9  ;;  %v125_v12 = vsub.f32 0.0, %v124_v10  ;;  %v187_v34 = vadd.f32 %v186_v24, %v74_v22  ;;  %vm81_vm1 = vcmp.ge.f32.partialorder %v73_v7, 0.0 }
  0x29   :  { %v86_v40 = vsub.f32 %v84_v27, %v85_v28  ;;  %v227_v42 = vadd.f32 %v226_v30, %v123_v25  ;;  %vm130_vm3 = vcmp.ge.f32.partialorder %v122_v8, 0.0  ;;  %v135_v45 = vsub.f32 %v133_v31, %v134_v32 }
  0x2a   :  { %v77_v13 = vmul.f32 1.442695, %v76_v11  ;;  %v126_v14 = vmul.f32 1.442695, %v125_v12  ;;  %v188_v49 = vrot.slane %v187_v34, 2 }
  0x2b   :  { %v228_v57 = vrot.slane %v227_v42, 2 }
  0x2c   :  { %275 = vpow2.f32 %v77_v13  ;;  %v189_v62 = vadd.f32 %v188_v49, %v187_v34 }
  0x2d   :  { %277 = vpow2.f32 %v126_v14  ;;  %v229_v7 = vadd.f32 %v228_v57, %v227_v42 }
  0x2e   :  { %v190_v12 = vrot.slane %v189_v62, 1 }
  0x2f   :  { %v230_v21 = vrot.slane %v229_v7, 1 }
  0x31   :  { %v231_v34 = vadd.f32 %v230_v21, %v229_v7 }
  0x39   :  { %v276_v15 = vpop.eup %275 }
  0x3a   :  { %v278_v16 = vpop.eup %277  ;;  %v79_v17 = vadd.f32 1.0, %v276_v15  ;;  %v90_v20 = vmul.f32 -0.5, %v276_v15  ;;  %v93_v29 = vand.u32 2147483647, %v276_v15 }
  0x3b   :  { %v128_v18 = vadd.f32 1.0, %v278_v16  ;;  %v139_v23 = vmul.f32 -0.5, %v278_v16  ;;  %v142_v35 = vand.u32 2147483647, %v278_v16 }
  0x3c   :  { %279 = vrcp.f32 %v79_v17  ;;  %v91_v26 = vadd.f32 1.0, %v90_v20  ;;  %vm385_vm2 = vcmp.lt.f32.partialorder %v93_v29, 0.0004427343 }
  0x3d   :  { %281 = vlog2.f32 %v79_v17  ;;  %v140_v33 = vadd.f32 1.0, %v139_v23  ;;  %vm143_vm4 = vcmp.lt.f32.partialorder %v142_v35, 0.0004427343 }
  0x3e   :  { %283 = vrcp.f32 %v128_v18  ;;  %v92_v37 = vmul.f32 %v276_v15, %v91_v26  ;;  %v191_v26 = vadd.f32 %v190_v12, %v189_v62 }
  0x3f   :  { %285 = vlog2.f32 %v128_v18  ;;  %v141_v46 = vmul.f32 %v278_v16, %v140_v33 }
  0x49   :  { %v280_v36 = vpop.eup %279 }
  0x4a   :  { %v282_v38 = vpop.eup %281  ;;  %v82_v39 = vmul.f32 %v280_v36, %v276_v15 }
  0x4b   :  { %v284_v43 = vpop.eup %283  ;;  %v89_v44 = vmul.f32 0.6931472, %v282_v38 }
  0x4c   :  { %v286_v47 = vpop.eup %285  ;;  %v83_v48 = vsel %vm81_vm1, %v280_v36, %v82_v39  ;;  %v131_v50 = vmul.f32 %v284_v43, %v278_v16 }
  0x4d   :  { %v95_v51 = vsel %vm385_vm2, %v92_v37, %v89_v44  ;;  %v97_v52 = vmul.f32 %v83_v48, %v74_v22  ;;  %v180_v53 = vrot.slane %v83_v48, 4  ;;  %v138_v54 = vmul.f32 0.6931472, %v286_v47 }
  0x4e   :  { %v96_v55 = vadd.f32 %v95_v51, %v86_v40  ;;  %v132_v56 = vsel %vm130_vm3, %v284_v43, %v131_v50 }
  0x4f   :  { %v174_v58 = vrot.slane %v97_v52, 4  ;;  %v181_v59 = vadd.f32 %v180_v53, %v83_v48  ;;  %v144_v60 = vsel %vm143_vm4, %v141_v46, %v138_v54  ;;  %v146_v61 = vmul.f32 %v132_v56, %v123_v25 }
  0x50   :  { %v192_v63 = vrot.slane %v96_v55, 4  ;;  %v145_v0 = vadd.f32 %v144_v60, %v135_v45  ;;  %v220_v1 = vrot.slane %v132_v56, 4 }
  0x51   :  { %v175_v2 = vadd.f32 %v174_v58, %v97_v52  ;;  %v182_v3 = vrot.slane %v181_v59, 2  ;;  %v214_v4 = vrot.slane %v146_v61, 4 }
  0x52   :  { %v193_v5 = vadd.f32 %v192_v63, %v96_v55  ;;  %v221_v6 = vadd.f32 %v220_v1, %v132_v56  ;;  %v232_v8 = vrot.slane %v145_v0, 4 }
  0x53   :  { %v176_v9 = vrot.slane %v175_v2, 2  ;;  %v183_v10 = vadd.f32 %v182_v3, %v181_v59  ;;  %v215_v11 = vadd.f32 %v214_v4, %v146_v61 }
  0x54   :  { %v194_v13 = vrot.slane %v193_v5, 2  ;;  %v222_v14 = vrot.slane %v221_v6, 2  ;;  %v233_v15 = vadd.f32 %v232_v8, %v145_v0 }
  0x55   :  { %v177_v16 = vadd.f32 %v176_v9, %v175_v2  ;;  %v184_v17 = vrot.slane %v183_v10, 1  ;;  %v216_v18 = vrot.slane %v215_v11, 2 }
  0x56   :  { %v195_v19 = vadd.f32 %v194_v13, %v193_v5  ;;  %v223_v20 = vadd.f32 %v222_v14, %v221_v6  ;;  %v234_v22 = vrot.slane %v233_v15, 2 }
  0x57   :  { %v178_v23 = vrot.slane %v177_v16, 1  ;;  %v185_v24 = vadd.f32 %v184_v17, %v183_v10  ;;  %v217_v25 = vadd.f32 %v216_v18, %v215_v11 }
  0x58   :  { %v196_v27 = vrot.slane %v195_v19, 1  ;;  %v224_v28 = vrot.slane %v223_v20, 1  ;;  %v235_v29 = vadd.f32 %v234_v22, %v233_v15 }
  0x59   :  { %v179_v30 = vadd.f32 %v178_v23, %v177_v16  ;;  %v218_v31 = vrot.slane %v217_v25, 1 }
  0x5a   :  { %v197_v32 = vadd.f32 %v196_v27, %v195_v19  ;;  %v225_v33 = vadd.f32 %v224_v28, %v223_v20  ;;  %v236_v35 = vrot.slane %v235_v29, 1 }
  0x5b   :  { %v203_v36 = vsel %vm202_vm5, %v185_v24, %v179_v30  ;;  %v219_v37 = vadd.f32 %v218_v31, %v217_v25 }
  0x5c   :  { %v205_v38 = vsel %vm204_vm6, %v191_v26, %v203_v36  ;;  %v237_v39 = vadd.f32 %v236_v35, %v235_v29 }
  0x5d   :  { %v207_v40 = vsel %vm206_vm7, %v197_v32, %v205_v38  ;;  %v242_v41 = vsel %vm202_vm5, %v225_v33, %v219_v37 }
  0x5e   :  { %209 = vst [vmem:[#allocation8] sm:$0xf] %v207_v40  ;;  %v243_v42 = vsel %vm204_vm6, %v231_v34, %v242_v41 }
  0x5f   :  { %v244_v43 = vsel %vm206_vm7, %v237_v39, %v243_v42 }
  0x60   :  { %247 = vst [vmem:[#allocation8 + $0x4] sm:$0xf] %v244_v43 }
  0x61   :  { %338 = shalt.err (!%p335_p0)
}
  0x62   :  { %s358_s22 = smov 64   ;;  %s359_s23 = smov 4  }
  0x63   :  { %259 = dma.vmem_to_hbm [thread:$0]  %s254_s1, 128, %s402_s2, [#allocation5], %s358_s22, %s358_s22, %s359_s23  }
  0x64   :  { %351 = dma.done.wait [#allocation5], 128  }
  0x65   :  { %352 = vsyncadd [#allocation5], 4294967168 }
  0x66   :  { %263 = vsyncpa [#allocation4], 1 }
  0x67   :  { %264 = vsyncpa [#allocation7], 1 }
  0x68   :  { %265 = vsyncpa [#allocation5], 1 }

</bundles_post_ra>
